<compile_context>
chip_gen: v7x
topology: tpu7x:2x2x1
jax: 0.10.0
libtpu: 0.0.40
codegen_flags: <defaults>
</compile_context>

<pallas_src>
import jax
import jax.numpy as jnp
from jax import lax
from jax.experimental import pallas as pl
from jax.experimental.pallas import tpu as pltpu

LOG_STD_MAX = 2.0
LOG_STD_MIN = -20.0


def _actor_kernel(state_ref,
                  w1_ref, b1_ref,
                  w2_ref, b2_ref,
                  whead_ref, bhead_ref,
                  out_ref):
    # bf16 MXU inputs, f32 accumulation; activations / clamp / exp stay f32.
    x = state_ref[...].astype(jnp.bfloat16)

    # feature_extractor: Linear -> Tanh -> Linear -> Tanh
    h = jnp.dot(x, w1_ref[...], preferred_element_type=jnp.float32) + b1_ref[...]
    h = jnp.tanh(h)
    h = jnp.dot(h.astype(jnp.bfloat16), w2_ref[...],
                preferred_element_type=jnp.float32) + b2_ref[...]
    h = jnp.tanh(h)

    # fused heads: y[:, :A] = mean, y[:, A:] = log_std
    y = jnp.dot(h.astype(jnp.bfloat16), whead_ref[...],
                preferred_element_type=jnp.float32) + bhead_ref[...]

    action_dim = out_ref.shape[-1] // 2
    lane = lax.broadcasted_iota(jnp.int32, y.shape, dimension=1)
    is_std_lane = lane >= action_dim
    std = jnp.exp(jnp.clip(y, LOG_STD_MIN, LOG_STD_MAX))  # only std lanes kept

    # single lane-dense store: [mean | std]
    out_ref[...] = jnp.where(is_std_lane, std, y).astype(out_ref.dtype)


def stochastic_actor_forward(state, params, *, batch_tile=256):
    """state: [B, state_dim] f32.

    params: dict with bf16 weights stored [in_dim, out_dim] and f32 biases [1, out];
            the two heads are pre-fused into whead/bhead with layout [mu | log_std].
    Returns (mean, std), each [B, action_dim] f32.
    """
    B, state_dim = state.shape
    h1 = params["w1"].shape[1]
    h2 = params["w2"].shape[1]
    two_a = params["whead"].shape[1]
    action_dim = two_a // 2

    # Batch tile: multiple of 8 sublanes, capped (keeps well under VMEM even on v7x).
    tb = min(batch_tile, ((B + 7) // 8) * 8)
    tb = ((tb + 7) // 8) * 8
    Bp = pl.cdiv(B, tb) * tb
    if Bp != B:
        state = jnp.pad(state, ((0, Bp - B), (0, 0)))
    grid = (Bp // tb,)

    def const(a):
        # full-array block, constant index -> stays VMEM-resident across the grid
        return pl.BlockSpec(a.shape, lambda i: (0,) * a.ndim)

    args = (state,
            params["w1"], params["b1"],
            params["w2"], params["b2"],
            params["whead"], params["bhead"])

    flops = 2 * Bp * (state_dim * h1 + h1 * h2 + h2 * two_a)
    transcendentals = Bp * (h1 + h2 + two_a)            # tanh + exp
    bytes_accessed = (state.size * state.dtype.itemsize
                      + sum(int(a.size) * a.dtype.itemsize for a in args[1:])
                      + Bp * two_a * 4)

    out = pl.pallas_call(
        _actor_kernel,
        out_shape=jax.ShapeDtypeStruct((Bp, two_a), jnp.float32),
        grid=grid,
        in_specs=[pl.BlockSpec((tb, state_dim), lambda i: (i, 0))]
                 + [const(a) for a in args[1:]],
        out_specs=pl.BlockSpec((tb, two_a), lambda i: (i, 0)),
        compiler_params=pltpu.CompilerParams(
            dimension_semantics=("parallel",)),   # v7x: shard batch over 2 TCs
        cost_estimate=pl.CostEstimate(
            flops=flops,
            transcendentals=transcendentals,
            bytes_accessed=bytes_accessed),
    )(*args)

    out = out[:B]
    return out[:, :action_dim], out[:, action_dim:]


def init_params(key, state_dim, hidden_size, action_dim):
    """Synthetic xavier-uniform init; mu weight scaled by 0.01, mu bias zeroed,
    mimicking the PyTorch __init__'s weights_init_ + mul_ tweaks."""
    ks = jax.random.split(key, 4)

    def xavier(k, fan_in, fan_out):
        limit = jnp.sqrt(6.0 / (fan_in + fan_out))
        return jax.random.uniform(k, (fan_in, fan_out), jnp.float32, -limit, limit)

    h1, h2 = hidden_size
    wmu = xavier(ks[2], h2, action_dim) * 0.01          # mu.weight.data.mul_(0.01)
    bmu = jnp.zeros((1, action_dim), jnp.float32)       # mu.bias.data.mul_(0.0)
    wls = xavier(ks[3], h2, action_dim)
    bls = jnp.zeros((1, action_dim), jnp.float32)
    return {
        "w1": xavier(ks[0], state_dim, h1).astype(jnp.bfloat16),
        "b1": jnp.zeros((1, h1), jnp.float32),
        "w2": xavier(ks[1], h1, h2).astype(jnp.bfloat16),
        "b2": jnp.zeros((1, h2), jnp.float32),
        # fused heads: columns [0:action_dim] = mu, [action_dim:] = log_std
        "whead": jnp.concatenate([wmu, wls], axis=1).astype(jnp.bfloat16),
        "bhead": jnp.concatenate([bmu, bls], axis=1),
    }


def reference_forward(state, params):
    """Pure-JAX reference following the same bf16-input / f32-accumulate path."""
    f32 = jnp.float32
    h = jnp.tanh(jnp.dot(state.astype(jnp.bfloat16), params["w1"],
                         preferred_element_type=f32) + params["b1"])
    h = jnp.tanh(jnp.dot(h.astype(jnp.bfloat16), params["w2"],
                         preferred_element_type=f32) + params["b2"])
    y = jnp.dot(h.astype(jnp.bfloat16), params["whead"],
                preferred_element_type=f32) + params["bhead"]
    ad = params["bhead"].shape[-1] // 2
    mean = y[:, :ad]
    std = jnp.exp(jnp.clip(y[:, ad:], LOG_STD_MIN, LOG_STD_MAX))
    return mean, std


if __name__ == "__main__":
    key = jax.random.PRNGKey(0)
    k_state, k_params = jax.random.split(key)

    B, STATE_DIM, ACTION_DIM = 8, 16, 8
    HIDDEN = (32, 32)

    state = jax.random.normal(k_state, (B, STATE_DIM), jnp.float32)
    params = init_params(k_params, STATE_DIM, HIDDEN, ACTION_DIM)

    mean, std = stochastic_actor_forward(state, params)
    jax.block_until_ready((mean, std))

    ref_mean, ref_std = reference_forward(state, params)
    assert mean.shape == (B, ACTION_DIM) and std.shape == (B, ACTION_DIM)
    assert jnp.allclose(mean, ref_mean, atol=1e-4, rtol=1e-4), "mean mismatch"
    assert jnp.allclose(std, ref_std, atol=1e-4, rtol=1e-4), "std mismatch"
    # TODO(synk): for real RL rollouts, wrap the whole rollout loop (env-step batches)
    # around this call so launch/weight-DMA overhead is amortized across many states.

    print("KERNEL_OK")
</pallas_src>

<mosaic_0001>
module attributes {stable_mosaic.version = 11 : i64} {
  func.func @_actor_kernel(%arg0: i32, %arg1: memref<8x16xf32, #tpu.memory_space<vmem>>, %arg2: memref<16x32xbf16, #tpu.memory_space<vmem>>, %arg3: memref<1x32xf32, #tpu.memory_space<vmem>>, %arg4: memref<32x32xbf16, #tpu.memory_space<vmem>>, %arg5: memref<1x32xf32, #tpu.memory_space<vmem>>, %arg6: memref<32x16xbf16, #tpu.memory_space<vmem>>, %arg7: memref<1x16xf32, #tpu.memory_space<vmem>>, %arg8: memref<8x16xf32, #tpu.memory_space<vmem>>) attributes {dimension_semantics = [#tpu.dimension_semantics<parallel>], iteration_bounds = array<i64: 1>, scalar_prefetch = 0 : i64, scratch_operands = 0 : i64, tpu.core_type = #tpu.core_type<tc>, window_params = [{transform_indices = @transform_0, window_bounds = array<i64: 8, 16>}, {pipeline_mode = #tpu.pipeline_mode<synchronous>, transform_indices = @transform_1, window_bounds = array<i64: 16, 32>}, {pipeline_mode = #tpu.pipeline_mode<synchronous>, transform_indices = @transform_2, window_bounds = array<i64: 1, 32>}, {pipeline_mode = #tpu.pipeline_mode<synchronous>, transform_indices = @transform_3, window_bounds = array<i64: 32, 32>}, {pipeline_mode = #tpu.pipeline_mode<synchronous>, transform_indices = @transform_4, window_bounds = array<i64: 1, 32>}, {pipeline_mode = #tpu.pipeline_mode<synchronous>, transform_indices = @transform_5, window_bounds = array<i64: 32, 16>}, {pipeline_mode = #tpu.pipeline_mode<synchronous>, transform_indices = @transform_6, window_bounds = array<i64: 1, 16>}, {transform_indices = @transform_7, window_bounds = array<i64: 8, 16>}]} {
    %c0 = arith.constant 0 : index
    %c0_0 = arith.constant 0 : index
    %0 = vector.load %arg1[%c0, %c0_0] : memref<8x16xf32, #tpu.memory_space<vmem>>, vector<8x16xf32>
    %1 = arith.truncf %0 : vector<8x16xf32> to vector<8x16xbf16>
    %c0_1 = arith.constant 0 : index
    %c0_2 = arith.constant 0 : index
    %2 = vector.load %arg2[%c0_1, %c0_2] : memref<16x32xbf16, #tpu.memory_space<vmem>>, vector<16x32xbf16>
    %cst = arith.constant dense<0.000000e+00> : vector<8x32xf32>
    %3 = tpu.matmul %1, %2, %cst {dimension_numbers = #tpu.dot_dimension_numbers<[1], [0], [0], [1], [0, 0, 1, 1], [], []>} : vector<8x16xbf16>, vector<16x32xbf16>, vector<8x32xf32> -> vector<8x32xf32>
    %c0_3 = arith.constant 0 : index
    %c0_4 = arith.constant 0 : index
    %4 = vector.load %arg3[%c0_3, %c0_4] : memref<1x32xf32, #tpu.memory_space<vmem>>, vector<1x32xf32>
    %5 = vector.broadcast %4 : vector<1x32xf32> to vector<8x32xf32>
    %6 = arith.addf %3, %5 : vector<8x32xf32>
    %7 = math.tanh %6 : vector<8x32xf32>
    %8 = arith.truncf %7 : vector<8x32xf32> to vector<8x32xbf16>
    %c0_5 = arith.constant 0 : index
    %c0_6 = arith.constant 0 : index
    %9 = vector.load %arg4[%c0_5, %c0_6] : memref<32x32xbf16, #tpu.memory_space<vmem>>, vector<32x32xbf16>
    %cst_7 = arith.constant dense<0.000000e+00> : vector<8x32xf32>
    %10 = tpu.matmul %8, %9, %cst_7 {dimension_numbers = #tpu.dot_dimension_numbers<[1], [0], [0], [1], [0, 0, 1, 1], [], []>} : vector<8x32xbf16>, vector<32x32xbf16>, vector<8x32xf32> -> vector<8x32xf32>
    %c0_8 = arith.constant 0 : index
    %c0_9 = arith.constant 0 : index
    %11 = vector.load %arg5[%c0_8, %c0_9] : memref<1x32xf32, #tpu.memory_space<vmem>>, vector<1x32xf32>
    %12 = vector.broadcast %11 : vector<1x32xf32> to vector<8x32xf32>
    %13 = arith.addf %10, %12 : vector<8x32xf32>
    %14 = math.tanh %13 : vector<8x32xf32>
    %15 = arith.truncf %14 : vector<8x32xf32> to vector<8x32xbf16>
    %c0_10 = arith.constant 0 : index
    %c0_11 = arith.constant 0 : index
    %16 = vector.load %arg6[%c0_10, %c0_11] : memref<32x16xbf16, #tpu.memory_space<vmem>>, vector<32x16xbf16>
    %cst_12 = arith.constant dense<0.000000e+00> : vector<8x16xf32>
    %17 = tpu.matmul %15, %16, %cst_12 {dimension_numbers = #tpu.dot_dimension_numbers<[1], [0], [0], [1], [0, 0, 1, 1], [], []>} : vector<8x32xbf16>, vector<32x16xbf16>, vector<8x16xf32> -> vector<8x16xf32>
    %c0_13 = arith.constant 0 : index
    %c0_14 = arith.constant 0 : index
    %18 = vector.load %arg7[%c0_13, %c0_14] : memref<1x16xf32, #tpu.memory_space<vmem>>, vector<1x16xf32>
    %19 = vector.broadcast %18 : vector<1x16xf32> to vector<8x16xf32>
    %20 = arith.addf %17, %19 : vector<8x16xf32>
    %21 = tpu.iota {dimensions = array<i32: 1>} : vector<8x16xi32>
    %c8_i32 = arith.constant 8 : i32
    %22 = vector.broadcast %c8_i32 : i32 to vector<8x16xi32>
    %23 = arith.cmpi sge, %21, %22 : vector<8x16xi32>
    %cst_15 = arith.constant -2.000000e+01 : f32
    %cst_16 = arith.constant 2.000000e+00 : f32
    %24 = vector.broadcast %cst_15 : f32 to vector<8x16xf32>
    %25 = arith.maximumf %24, %20 : vector<8x16xf32>
    %26 = vector.broadcast %cst_16 : f32 to vector<8x16xf32>
    %27 = arith.minimumf %26, %25 : vector<8x16xf32>
    %28 = math.exp %27 : vector<8x16xf32>
    %29 = arith.select %23, %28, %20 : vector<8x16xi1>, vector<8x16xf32>
    %c0_17 = arith.constant 0 : index
    %c0_18 = arith.constant 0 : index
    %30 = vector.load %arg8[%c0_17, %c0_18] : memref<8x16xf32, #tpu.memory_space<vmem>>, vector<8x16xf32>
    tpu.vector_store %arg8[%c0_17, %c0_18], %29 {strides = array<i32>} : memref<8x16xf32, #tpu.memory_space<vmem>>, vector<8x16xf32>,
    return
  }
  func.func @transform_0(%arg0: i32) -> (i32, i32) {
    %c0_i32 = arith.constant 0 : i32
    %c0_i32_0 = arith.constant 0 : i32
    return %arg0, %c0_i32 : i32, i32
  }
  func.func @transform_1(%arg0: i32) -> (i32, i32) {
    %c0_i32 = arith.constant 0 : i32
    %c0_i32_0 = arith.constant 0 : i32
    %c0_i32_1 = arith.constant 0 : i32
    return %c0_i32, %c0_i32_0 : i32, i32
  }
  func.func @transform_2(%arg0: i32) -> (i32, i32) {
    %c0_i32 = arith.constant 0 : i32
    %c0_i32_0 = arith.constant 0 : i32
    %c0_i32_1 = arith.constant 0 : i32
    return %c0_i32, %c0_i32_0 : i32, i32
  }
  func.func @transform_3(%arg0: i32) -> (i32, i32) {
    %c0_i32 = arith.constant 0 : i32
    %c0_i32_0 = arith.constant 0 : i32
    %c0_i32_1 = arith.constant 0 : i32
    return %c0_i32, %c0_i32_0 : i32, i32
  }
  func.func @transform_4(%arg0: i32) -> (i32, i32) {
    %c0_i32 = arith.constant 0 : i32
    %c0_i32_0 = arith.constant 0 : i32
    %c0_i32_1 = arith.constant 0 : i32
    return %c0_i32, %c0_i32_0 : i32, i32
  }
  func.func @transform_5(%arg0: i32) -> (i32, i32) {
    %c0_i32 = arith.constant 0 : i32
    %c0_i32_0 = arith.constant 0 : i32
    %c0_i32_1 = arith.constant 0 : i32
    return %c0_i32, %c0_i32_0 : i32, i32
  }
  func.func @transform_6(%arg0: i32) -> (i32, i32) {
    %c0_i32 = arith.constant 0 : i32
    %c0_i32_0 = arith.constant 0 : i32
    %c0_i32_1 = arith.constant 0 : i32
    return %c0_i32, %c0_i32_0 : i32, i32
  }
  func.func @transform_7(%arg0: i32) -> (i32, i32) {
    %c0_i32 = arith.constant 0 : i32
    %c0_i32_0 = arith.constant 0 : i32
    return %arg0, %c0_i32 : i32, i32
  }
}

</mosaic_0001>

<bundles_post_ra>
// kernel: tpu_custom_call.1
= control target key start
LH: loop header
LB: loop body
LE: loop exit
PB: predicated region body
PF: predicated region fallthrough
CT: control target
= control target key end

     0   :  { %12 = vsyncpa [#allocation3], 0  ;;  %s468_s0 = inlined_call_operand.vmem [shape: f32[8,16], index: 0, kind: input, shape index: {}]   ;;  %s469_s1 = inlined_call_operand.hbm [shape: bf16[16,32], index: 1, kind: input, shape index: {}]   ;;  %s470_s2 = inlined_call_operand.vmem [shape: f32[1,32], index: 2, kind: input, shape index: {}]   ;;  %s471_s3 = inlined_call_operand.vmem [shape: bf16[32,32], index: 3, kind: input, shape index: {}]   ;;  %s472_s4 = inlined_call_operand.vmem [shape: f32[1,32], index: 4, kind: input, shape index: {}]   ;;  %s473_s5 = inlined_call_operand.vmem [shape: bf16[32,16], index: 5, kind: input, shape index: {}]   ;;  %s474_s6 = inlined_call_operand.vmem [shape: f32[1,16], index: 6, kind: input, shape index: {}]   ;;  %s475_s7 = inlined_call_operand.hbm [shape: f32[8,16], index: 7, kind: output, shape index: {}]  }
   0x1   :  { %13 = vsyncpa [#allocation4], 0  ;;  %s370_s24 = smov [#allocation2]   ;;  %s322_s28 = scalar_lea.hbm %s469_s1, 128 }
   0x2   :  { %s21_s25 = sshll.u32 %s370_s24, 4  ;;  %p323_p0 = scmp.ne.s32.totalorder %s469_s1, %s322_s28  ;;  %s22_s25 = int_to_ptr.vmem [resolvable:$true] %s21_s25 }
   0x3   :  { %p326_p1 = scmp.lt.u32.totalorder %s322_s28, %s469_s1 }
   0x5   :  { %p328_p2 = pnand %p326_p1, %p323_p0 }
   0x7   :  { %331 = shalt.err (!%p328_p2)
}
   0x8   :  { %s332_s10 = scalar_lea.vmem %s22_s25, 128  ;;  %p337_p4 = scmp.lt.s32.totalorder %s22_s25, %s22_s25 }
   0x9   :  { %p333_p3 = scmp.ne.s32.totalorder %s22_s25, %s332_s10  ;;  %p338_p5 = scmp.lt.s32.totalorder %s332_s10, %s332_s10 }
   0xb   :  { %p339_p6 = por %p338_p5, %p337_p4 }
   0xd   :  { %p340_p7 = pnand %p339_p6, %p333_p3 }
   0xf   :  { %343 = shalt.err (!%p340_p7)
}
  0x10   :  { %s371_s11 = smov 64   ;;  %s372_s12 = smov 4  }
  0x11   :  { %27 = dma.hbm_to_vmem [thread:$0]  %s469_s1, 128, %s22_s25, [#allocation3], %s371_s11, %s371_s11, %s372_s12  }
  0x12   :  { %366 = dma.done.wait [#allocation3], 128  }
  0x13   :  { %367 = vsyncadd [#allocation3], 4294967168  ;;  %v373_v0 = vmov 0.0   ;;  %vm374_vm0 = vmmov 0   ;;  %v311_v1 = vld [vmem:[#allocation2] sm:$0xff]   ;;  %vm59_vm1 = vcmask 130048   ;;  %v240_v33 = vlaneseq }
  0x14   :  { %283 = vmatprep.subr.bf16.mxu0 %v373_v0  ;;  %285 = vmatprep.mubr.msk.bf16.mxu0 %vm374_vm0, %v373_v0  ;;  %v42_v2 = vld [vmem:[%s468_s0] sm:$0xff]  ;;  %v313_v5 = vld [vmem:[%s471_s3 + $0x8] sm:$0xff]   ;;  %vm128_vm2 = vcmask 261120  }
  0x15   :  { %289 = vmatprep.subr.bf16.mxu1 %v373_v0  ;;  %293 = vmatprep.mubr.msk.bf16.mxu1 %vm374_vm0, %v373_v0  ;;  %v43_v3 = vpack.c.bf16 %v42_v2, %v42_v2  ;;  %v312_v4 = vld [vmem:[%s471_s3] sm:$0xff]   ;;  %v315_v15 = vld [vmem:[%s473_s5 + $0x8] sm:$0xff]   ;;  %v241_v34 = vand.u32 127, %v240_v33 }
  0x16   :  { %284 = vmatpush3.bf16.msra.mxu0 %v311_v1  ;;  %290 = vmatpush3.bf16.msra.mxu1 %v312_v4  ;;  %v264_v6 = vld [vmem:[%s470_s2] ss:$0 sm:$0xff] }
  0x17   :  { %297 = vmatprep.subr.bf16.mxu0 %v373_v0  ;;  %291 = vmatprep.subr.bf16.mxu1 %v373_v0  ;;  %v314_v14 = vld [vmem:[%s473_s5] sm:$0xff]   ;;  %vm242_vm3 = vcmp.ge.s32.totalorder %v241_v34, 8 }
  0x18   :  { %v267_v16 = vld [vmem:[%s472_s4] ss:$0 sm:$0xff]  ;;  %s375_s4 = smov [#allocation5]  }
  0x19   :  { %286 = vmatmul.mubr.msk.bf16.vlgmr.msra.gmra.mrb[0].mxu0 %vm59_vm1, %v43_v3  ;;  %v271_v24 = vld [vmem:[%s474_s6] ss:$0 sm:$0xff]  ;;  %s255_s5 = sshll.u32 %s375_s4, 4  ;;  %s256_s5 = int_to_ptr.vmem [resolvable:$true] %s255_s5 }
  0x1a   :  { %301 = vmatprep.mubr.msk.bf16.mxu0 %vm374_vm0, %v373_v0  ;;  %292 = vmatpush3.bf16.msra.mxu1 %v313_v5  ;;  %s344_s6 = scalar_lea.vmem %s256_s5, 128  ;;  %p349_p9 = scmp.lt.s32.totalorder %s256_s5, %s256_s5 }
  0x1b   :  { %298 = vmatpush3.bf16.msra.mxu0 %v314_v14  ;;  %p345_p8 = scmp.ne.s32.totalorder %s256_s5, %s344_s6  ;;  %p350_p10 = scmp.lt.s32.totalorder %s344_s6, %s344_s6 }
  0x1c   :  { %299 = vmatprep.subr.bf16.mxu0 %v373_v0 }
  0x1d   :  { %p351_p11 = por %p350_p10, %p349_p9 }
  0x1f   :  { %300 = vmatpush3.bf16.msra.mxu0 %v315_v15  ;;  %p352_p12 = pnand %p351_p11, %p345_p8 }
  0xec   :  { %v97_v7 = vpop.f32.mrb[0].mxu0 }
  0xed   :  { %v98_v8 = vadd.f32 %v264_v6, %v97_v7  ;;  %v287_v9 = vpop.f32.mrb[1].mxu0 }
  0xee   :  { %v100_v10 = vpop.f32.mrb[2].mxu0 }
  0xef   :  { %316 = vtanh.f32 %v98_v8  ;;  %v288_v11 = vpop.f32.mrb[3].mxu0 }
  0xf9   :  { %v317_v12 = vpop.eup %316 }
  0xfa   :  { %v104_v13 = vpack.c.bf16 %v317_v12, %v317_v12 }
  0xfc   :  { %294 = vmatmul.mubr.msk.bf16.vlgmr.msra.gmra.mrb[0].mxu1 %vm128_vm2, %v104_v13 }
 0x1cf   :  { %v166_v17 = vpop.f32.mrb[0].mxu1 }
 0x1d0   :  { %v167_v18 = vadd.f32 %v267_v16, %v166_v17  ;;  %v295_v19 = vpop.f32.mrb[1].mxu1 }
 0x1d1   :  { %v169_v20 = vpop.f32.mrb[2].mxu1 }
 0x1d2   :  { %318 = vtanh.f32 %v167_v18  ;;  %v296_v21 = vpop.f32.mrb[3].mxu1 }
 0x1dc   :  { %v319_v22 = vpop.eup %318 }
 0x1dd   :  { %v173_v23 = vpack.c.bf16 %v319_v22, %v319_v22 }
 0x1df   :  { %302 = vmatmul.mubr.msk.bf16.vlgmr.msra.gmra.mrb[4].mxu0 %vm128_vm2, %v173_v23 }
 0x2b2   :  { %v234_v25 = vpop.f32.mrb[4].mxu0 }
 0x2b3   :  { %v235_v26 = vadd.f32 %v271_v24, %v234_v25  ;;  %v303_v27 = vpop.f32.mrb[5].mxu0 }
 0x2b4   :  { %v237_v28 = vpop.f32.mrb[6].mxu0 }
 0x2b5   :  { %v243_v29 = vmax.f32 %v235_v26, -20.0  ;;  %v304_v30 = vpop.f32.mrb[7].mxu0 }
 0x2b7   :  { %v244_v31 = vmin.f32 %v243_v29, 2.0 }
 0x2b9   :  { %v245_v32 = vmul.f32 1.442695, %v244_v31 }
 0x2bb   :  { %320 = vpow2.f32 %v245_v32 }
 0x2c5   :  { %v321_v35 = vpop.eup %320 }
 0x2c6   :  { %v247_v36 = vsel %vm242_vm3, %v321_v35, %v235_v26 }
 0x2c7   :  { %248 = vst.msk [vmem:[#allocation5] sm:$0xff] %vm59_vm1, %v247_v36 }
 0x2c8   :  { %355 = shalt.err (!%p352_p12)
}
 0x2c9   :  { %s356_s29 = scalar_lea.hbm %s475_s7, 128 }
 0x2ca   :  { %p357_p13 = scmp.ne.s32.totalorder %s475_s7, %s356_s29  ;;  %p360_p0 = scmp.lt.u32.totalorder %s356_s29, %s475_s7 }
 0x2cc   :  { %p362_p1 = pnand %p360_p0, %p357_p13 }
 0x2ce   :  { %365 = shalt.err (!%p362_p1)
}
 0x2cf   :  { %258 = dma.vmem_to_hbm [thread:$0]  %s256_s5, 128, %s475_s7, [#allocation4]  }
 0x2d0   :  { %368 = dma.done.wait [#allocation4], 128  }
 0x2d1   :  { %369 = vsyncadd [#allocation4], 4294967168 }
 0x2d2   :  { %262 = vsyncpa [#allocation3], 1 }
 0x2d3   :  { %263 = vsyncpa [#allocation4], 1 }

</bundles_post_ra>
